<compile_context>
chip_gen: v7x
topology: tpu7x:2x2x1
jax: 0.10.0
libtpu: 0.0.40
codegen_flags: <defaults>
</compile_context>

<pallas_src>
import functools

import jax
import jax.numpy as jnp
from jax import lax
from jax.experimental import pallas as pl
from jax.experimental.pallas import tpu as pltpu

N_EMBD = 64
HEAD_SIZE = 16
NUM_HEADS = 4          # num_heads * head_size == n_embd
BLOCK_SIZE = 32        # causal-mask / max sequence length


def _mha_kernel(x_ref, wqkv_ref, wo_ref, bo_ref, o_ref, *, bb, T, H, hs):
    """Fused causal multi-head self-attention for `bb` batch elements.

    x_ref    : (bb*T, D)        activations for this step (row slab)
    wqkv_ref : (D, 3*H*hs)      packed [Wq*scale | Wk | Wv], columns per head
    wo_ref   : (H, hs, D)       output projection split per head (concat fused as sum)
    bo_ref   : (1, D)           output projection bias
    o_ref    : (bb*T, D)
    """
    D = H * hs
    x = x_ref[...]                                                     # (bb*T, D)

    # One wide fused QKV projection for the whole row slab (lane-dense MXU use).
    qkv = jnp.dot(x, wqkv_ref[...], preferred_element_type=jnp.float32)  # (bb*T, 3*H*hs)

    # Causal mask (diagonal always unmasked, so the row max below stays finite).
    row = lax.broadcasted_iota(jnp.int32, (T, T), 0)
    col = lax.broadcasted_iota(jnp.int32, (T, T), 1)
    causal = row >= col
    neg_inf = jnp.float32(-jnp.inf)

    # Bias folded into the accumulator init; hoisted (JAX doesn't CSE broadcasts).
    bias_tile = jnp.broadcast_to(bo_ref[...].astype(jnp.float32), (T, D))

    for b in range(bb):                       # static unroll over batches in the slab
        r0 = b * T
        qkv_b = qkv[r0:r0 + T]                # (T, 3*H*hs), sublane-aligned static slice
        acc = bias_tile
        for h in range(H):                    # static unroll over heads
            q = qkv_b[:, h * hs:(h + 1) * hs]                    # scale already in Wq
            k = qkv_b[:, (H + h) * hs:(H + h + 1) * hs]
            v = qkv_b[:, (2 * H + h) * hs:(2 * H + h + 1) * hs]

            # scores: contract on the head dim (no explicit transpose needed)
            s = jnp.einsum('qd,kd->qk', q, k,
                           preferred_element_type=jnp.float32)    # (T, T)
            s = jnp.where(causal, s, neg_inf)

            # numerically stable softmax; divide deferred past the PV matmul
            m = jnp.max(s, axis=-1, keepdims=True)
            p = jnp.exp(s - m)
            l = jnp.sum(p, axis=-1, keepdims=True)                # (T, 1)

            o_h = jnp.dot(p, v, preferred_element_type=jnp.float32)   # (T, hs)
            o_h = o_h * pl.reciprocal(l, approx=False)            # T recips, T*hs muls

            # concat([o_0..o_{H-1}]) @ Wproj == sum_h o_h @ Wproj[h*hs:(h+1)*hs, :]
            acc = acc + jnp.dot(o_h, wo_ref[h], preferred_element_type=jnp.float32)

        o_ref[r0:r0 + T, :] = acc.astype(o_ref.dtype)


def multi_head_attention(x, wq, wk, wv, wproj, bproj, *, batches_per_step=None):
    """x: (B, T, n_embd) -> (B, T, n_embd).

    wq/wk/wv : (H, n_embd, head_size)   stored (in, out); kernel computes x @ W
    wproj    : (n_embd, n_embd)         torch W.T, so y = cat @ wproj + bproj
    bproj    : (n_embd,)
    """
    B, T, D = x.shape
    H, _, hs = wq.shape
    assert H * hs == D, "num_heads * head_size must equal n_embd"
    assert T <= BLOCK_SIZE, "sequence longer than the causal-mask block_size"
    assert T % 8 == 0, "T must be a sublane multiple for the flat row-slab layout"

    scale = D ** -0.5       # characterGPT Head scales scores by C**-0.5 with C=n_embd

    # Pack Q/K/V into one wide weight; fold the softmax scale into Wq.
    wq_f = (wq * scale).transpose(1, 0, 2).reshape(D, H * hs)
    wk_f = wk.transpose(1, 0, 2).reshape(D, H * hs)
    wv_f = wv.transpose(1, 0, 2).reshape(D, H * hs)
    wqkv = jnp.concatenate([wq_f, wk_f, wv_f], axis=1)       # (D, 3*H*hs)
    wo = wproj.reshape(H, hs, D)                             # row blocks, one per head
    b2 = bproj.reshape(1, D)

    # Rows per grid step: target ~512 rows, keep grid >= 2 for v7x megacore.
    if batches_per_step is None:
        bb = max(1, min(B, max(1, 512 // T)))
        if B >= 2:
            bb = min(bb, max(1, B // 2))
    else:
        bb = max(1, min(batches_per_step, B))
    while B % bb:           # bb must divide B
        bb -= 1
    grid = B // bb
    rows = bb * T

    x_flat = x.reshape(B * T, D)                             # free, contiguous reshape

    kernel = functools.partial(_mha_kernel, bb=bb, T=T, H=H, hs=hs)

    flops = (2 * B * T * D * 3 * H * hs                      # fused QKV projection
             + B * H * (2 * T * T * hs                       # q @ k^T
                        + 2 * T * T * hs                     # p @ v
                        + 2 * T * hs * D))                   # per-head output proj
    bytes_accessed = 4 * (2 * B * T * D + D * 3 * H * hs + D * D + D)

    out_flat = pl.pallas_call(
        kernel,
        out_shape=jax.ShapeDtypeStruct((B * T, D), x.dtype),
        grid_spec=pltpu.PrefetchScalarGridSpec(
            num_scalar_prefetch=0,
            grid=(grid,),
            in_specs=[
                pl.BlockSpec((rows, D), lambda i: (i, 0)),           # x row slab
                pl.BlockSpec((D, 3 * H * hs), lambda i: (0, 0)),     # packed Wqkv (resident)
                pl.BlockSpec((H, hs, D), lambda i: (0, 0, 0)),       # Wproj per-head split
                pl.BlockSpec((1, D), lambda i: (0, 0)),              # bproj
            ],
            out_specs=pl.BlockSpec((rows, D), lambda i: (i, 0)),
        ),
        compiler_params=pltpu.CompilerParams(
            dimension_semantics=("parallel",),                       # megacore-shardable
            vmem_limit_bytes=32 * 1024 * 1024,                       # far from binding
        ),
        cost_estimate=pl.CostEstimate(
            flops=flops,
            transcendentals=B * H * (T * T + T),                     # exps + reciprocals
            bytes_accessed=bytes_accessed,
        ),
    )(x_flat, wqkv, wo, b2)

    return out_flat.reshape(B, T, D)


def reference(x, wq, wk, wv, wproj, bproj):
    """Pure-JAX mirror of the PyTorch MultiHeadAttention forward (dropout p=0)."""
    B, T, D = x.shape
    H = wq.shape[0]
    scale = 1.0 / (D ** 0.5)
    mask = jnp.tril(jnp.ones((T, T), dtype=bool))
    outs = []
    for h in range(H):
        q = x @ wq[h]
        k = x @ wk[h]
        v = x @ wv[h]
        w = jnp.einsum('btk,bsk->bts', q, k) * scale
        w = jnp.where(mask, w, -jnp.inf)
        w = jax.nn.softmax(w, axis=-1)
        outs.append(jnp.einsum('bts,bsk->btk', w, v))
    cat = jnp.concatenate(outs, axis=-1)
    return cat @ wproj + bproj


if __name__ == "__main__":
    key = jax.random.PRNGKey(0)
    ks = jax.random.split(key, 6)

    B, T = 2, BLOCK_SIZE
    D, H, hs = N_EMBD, NUM_HEADS, HEAD_SIZE

    x = jax.random.normal(ks[0], (B, T, D), dtype=jnp.float32)

    # deterministic parameter init; weights stored (in, out) so kernel computes x @ W
    wq = jax.random.normal(ks[1], (H, D, hs), jnp.float32) / jnp.sqrt(D)
    wk = jax.random.normal(ks[2], (H, D, hs), jnp.float32) / jnp.sqrt(D)
    wv = jax.random.normal(ks[3], (H, D, hs), jnp.float32) / jnp.sqrt(D)
    wproj = jax.random.normal(ks[4], (D, D), jnp.float32) / jnp.sqrt(D)
    bproj = jax.random.normal(ks[5], (D,), jnp.float32) * 0.01

    out = multi_head_attention(x, wq, wk, wv, wproj, bproj)
    out = jax.block_until_ready(out)

    ref = reference(x, wq, wk, wv, wproj, bproj)
    assert out.shape == (B, T, D)
    assert jnp.allclose(out, ref, atol=1e-4, rtol=1e-4), "mismatch vs reference"

    print("KERNEL_OK")
</pallas_src>

<mosaic_0001>
module attributes {stable_mosaic.version = 11 : i64} {
  func.func @_mha_kernel(%arg0: i32, %arg1: memref<32x64xf32, #tpu.memory_space<vmem>>, %arg2: memref<64x192xf32, #tpu.memory_space<vmem>>, %arg3: memref<4x16x64xf32, #tpu.memory_space<vmem>>, %arg4: memref<1x64xf32, #tpu.memory_space<vmem>>, %arg5: memref<32x64xf32, #tpu.memory_space<vmem>>) attributes {dimension_semantics = [#tpu.dimension_semantics<parallel>], iteration_bounds = array<i64: 2>, scalar_prefetch = 0 : i64, scratch_operands = 0 : i64, tpu.core_type = #tpu.core_type<tc>, window_params = [{transform_indices = @transform_0, window_bounds = array<i64: 32, 64>}, {pipeline_mode = #tpu.pipeline_mode<synchronous>, transform_indices = @transform_1, window_bounds = array<i64: 64, 192>}, {pipeline_mode = #tpu.pipeline_mode<synchronous>, transform_indices = @transform_2, window_bounds = array<i64: 4, 16, 64>}, {pipeline_mode = #tpu.pipeline_mode<synchronous>, transform_indices = @transform_3, window_bounds = array<i64: 1, 64>}, {transform_indices = @transform_4, window_bounds = array<i64: 32, 64>}]} {
    %c0 = arith.constant 0 : index
    %c0_0 = arith.constant 0 : index
    %0 = vector.load %arg1[%c0, %c0_0] : memref<32x64xf32, #tpu.memory_space<vmem>>, vector<32x64xf32>
    %c0_1 = arith.constant 0 : index
    %c0_2 = arith.constant 0 : index
    %1 = vector.load %arg2[%c0_1, %c0_2] : memref<64x192xf32, #tpu.memory_space<vmem>>, vector<64x192xf32>
    %cst = arith.constant dense<0.000000e+00> : vector<32x192xf32>
    %2 = tpu.matmul %0, %1, %cst {dimension_numbers = #tpu.dot_dimension_numbers<[1], [0], [0], [1], [0, 0, 1, 1], [], []>} : vector<32x64xf32>, vector<64x192xf32>, vector<32x192xf32> -> vector<32x192xf32>
    %3 = tpu.iota {dimensions = array<i32: 0>} : vector<32x32xi32>
    %4 = tpu.iota {dimensions = array<i32: 1>} : vector<32x32xi32>
    %5 = arith.cmpi sge, %3, %4 : vector<32x32xi32>
    %c0_3 = arith.constant 0 : index
    %c0_4 = arith.constant 0 : index
    %6 = vector.load %arg4[%c0_3, %c0_4] : memref<1x64xf32, #tpu.memory_space<vmem>>, vector<1x64xf32>
    %7 = vector.shape_cast %6 : vector<1x64xf32> to vector<1x64xf32>
    %8 = vector.broadcast %7 : vector<1x64xf32> to vector<32x64xf32>
    %9 = vector.extract_strided_slice %2 {offsets = [0, 0], sizes = [32, 16], strides = [1, 1]} : vector<32x192xf32> to vector<32x16xf32>
    %10 = vector.extract_strided_slice %2 {offsets = [0, 64], sizes = [32, 16], strides = [1, 1]} : vector<32x192xf32> to vector<32x16xf32>
    %11 = vector.extract_strided_slice %2 {offsets = [0, 128], sizes = [32, 16], strides = [1, 1]} : vector<32x192xf32> to vector<32x16xf32>
    "tpu.trace_start"() <{level = 10 : i32, message = "qd,kd->qk"}> : () -> ()
    %cst_5 = arith.constant dense<0.000000e+00> : vector<32x32xf32>
    %12 = tpu.matmul %9, %10, %cst_5 {dimension_numbers = #tpu.dot_dimension_numbers<[1], [1], [0], [0], [0, 0, 1, 0], [], []>} : vector<32x16xf32>, vector<32x16xf32>, vector<32x32xf32> -> vector<32x32xf32>
    %cst_6 = arith.constant 0xFF800000 : f32
    "tpu.trace_stop"() : () -> ()
    %13 = vector.broadcast %cst_6 : f32 to vector<32x32xf32>
    %14 = arith.select %5, %12, %13 : vector<32x32xi1>, vector<32x32xf32>
    %cst_7 = arith.constant dense<0xFF800000> : vector<32xf32>
    %15 = vector.multi_reduction <maximumf>, %14, %cst_7 [1] : vector<32x32xf32> to vector<32xf32>
    %16 = vector.shape_cast %15 : vector<32xf32> to vector<32x1xf32>
    %17 = vector.broadcast %16 : vector<32x1xf32> to vector<32x32xf32>
    %18 = arith.subf %14, %17 : vector<32x32xf32>
    %19 = math.exp %18 : vector<32x32xf32>
    %cst_8 = arith.constant dense<0.000000e+00> : vector<32xf32>
    %20 = vector.multi_reduction <add>, %19, %cst_8 [1] : vector<32x32xf32> to vector<32xf32>
    %21 = vector.shape_cast %20 : vector<32xf32> to vector<32x1xf32>
    %cst_9 = arith.constant dense<0.000000e+00> : vector<32x16xf32>
    %22 = tpu.matmul %19, %11, %cst_9 {dimension_numbers = #tpu.dot_dimension_numbers<[1], [0], [0], [1], [0, 0, 1, 1], [], []>} : vector<32x32xf32>, vector<32x16xf32>, vector<32x16xf32> -> vector<32x16xf32>
    %23 = tpu.reciprocal %21 : vector<32x1xf32> -> vector<32x1xf32>
    %24 = vector.broadcast %23 : vector<32x1xf32> to vector<32x16xf32>
    %25 = arith.mulf %22, %24 : vector<32x16xf32>
    %c0_10 = arith.constant 0 : index
    %c0_11 = arith.constant 0 : index
    %c0_12 = arith.constant 0 : index
    %26 = vector.load %arg3[%c0_10, %c0_11, %c0_12] : memref<4x16x64xf32, #tpu.memory_space<vmem>>, vector<1x16x64xf32>
    %27 = vector.shape_cast %26 : vector<1x16x64xf32> to vector<16x64xf32>
    %cst_13 = arith.constant dense<0.000000e+00> : vector<32x64xf32>
    %28 = tpu.matmul %25, %27, %cst_13 {dimension_numbers = #tpu.dot_dimension_numbers<[1], [0], [0], [1], [0, 0, 1, 1], [], []>} : vector<32x16xf32>, vector<16x64xf32>, vector<32x64xf32> -> vector<32x64xf32>
    %29 = arith.addf %8, %28 : vector<32x64xf32>
    %30 = vector.extract_strided_slice %2 {offsets = [0, 16], sizes = [32, 16], strides = [1, 1]} : vector<32x192xf32> to vector<32x16xf32>
    %31 = vector.extract_strided_slice %2 {offsets = [0, 80], sizes = [32, 16], strides = [1, 1]} : vector<32x192xf32> to vector<32x16xf32>
    %32 = vector.extract_strided_slice %2 {offsets = [0, 144], sizes = [32, 16], strides = [1, 1]} : vector<32x192xf32> to vector<32x16xf32>
    "tpu.trace_start"() <{level = 10 : i32, message = "qd,kd->qk"}> : () -> ()
    %cst_14 = arith.constant dense<0.000000e+00> : vector<32x32xf32>
    %33 = tpu.matmul %30, %31, %cst_14 {dimension_numbers = #tpu.dot_dimension_numbers<[1], [1], [0], [0], [0, 0, 1, 0], [], []>} : vector<32x16xf32>, vector<32x16xf32>, vector<32x32xf32> -> vector<32x32xf32>
    %cst_15 = arith.constant 0xFF800000 : f32
    "tpu.trace_stop"() : () -> ()
    %34 = vector.broadcast %cst_15 : f32 to vector<32x32xf32>
    %35 = arith.select %5, %33, %34 : vector<32x32xi1>, vector<32x32xf32>
    %cst_16 = arith.constant dense<0xFF800000> : vector<32xf32>
    %36 = vector.multi_reduction <maximumf>, %35, %cst_16 [1] : vector<32x32xf32> to vector<32xf32>
    %37 = vector.shape_cast %36 : vector<32xf32> to vector<32x1xf32>
    %38 = vector.broadcast %37 : vector<32x1xf32> to vector<32x32xf32>
    %39 = arith.subf %35, %38 : vector<32x32xf32>
    %40 = math.exp %39 : vector<32x32xf32>
    %cst_17 = arith.constant dense<0.000000e+00> : vector<32xf32>
    %41 = vector.multi_reduction <add>, %40, %cst_17 [1] : vector<32x32xf32> to vector<32xf32>
    %42 = vector.shape_cast %41 : vector<32xf32> to vector<32x1xf32>
    %cst_18 = arith.constant dense<0.000000e+00> : vector<32x16xf32>
    %43 = tpu.matmul %40, %32, %cst_18 {dimension_numbers = #tpu.dot_dimension_numbers<[1], [0], [0], [1], [0, 0, 1, 1], [], []>} : vector<32x32xf32>, vector<32x16xf32>, vector<32x16xf32> -> vector<32x16xf32>
    %44 = tpu.reciprocal %42 : vector<32x1xf32> -> vector<32x1xf32>
    %45 = vector.broadcast %44 : vector<32x1xf32> to vector<32x16xf32>
    %46 = arith.mulf %43, %45 : vector<32x16xf32>
    %c1 = arith.constant 1 : index
    %c0_19 = arith.constant 0 : index
    %c0_20 = arith.constant 0 : index
    %47 = vector.load %arg3[%c1, %c0_19, %c0_20] : memref<4x16x64xf32, #tpu.memory_space<vmem>>, vector<1x16x64xf32>
    %48 = vector.shape_cast %47 : vector<1x16x64xf32> to vector<16x64xf32>
    %cst_21 = arith.constant dense<0.000000e+00> : vector<32x64xf32>
    %49 = tpu.matmul %46, %48, %cst_21 {dimension_numbers = #tpu.dot_dimension_numbers<[1], [0], [0], [1], [0, 0, 1, 1], [], []>} : vector<32x16xf32>, vector<16x64xf32>, vector<32x64xf32> -> vector<32x64xf32>
    %50 = arith.addf %29, %49 : vector<32x64xf32>
    %51 = vector.extract_strided_slice %2 {offsets = [0, 32], sizes = [32, 16], strides = [1, 1]} : vector<32x192xf32> to vector<32x16xf32>
    %52 = vector.extract_strided_slice %2 {offsets = [0, 96], sizes = [32, 16], strides = [1, 1]} : vector<32x192xf32> to vector<32x16xf32>
    %53 = vector.extract_strided_slice %2 {offsets = [0, 160], sizes = [32, 16], strides = [1, 1]} : vector<32x192xf32> to vector<32x16xf32>
    "tpu.trace_start"() <{level = 10 : i32, message = "qd,kd->qk"}> : () -> ()
    %cst_22 = arith.constant dense<0.000000e+00> : vector<32x32xf32>
    %54 = tpu.matmul %51, %52, %cst_22 {dimension_numbers = #tpu.dot_dimension_numbers<[1], [1], [0], [0], [0, 0, 1, 0], [], []>} : vector<32x16xf32>, vector<32x16xf32>, vector<32x32xf32> -> vector<32x32xf32>
    %cst_23 = arith.constant 0xFF800000 : f32
    "tpu.trace_stop"() : () -> ()
    %55 = vector.broadcast %cst_23 : f32 to vector<32x32xf32>
    %56 = arith.select %5, %54, %55 : vector<32x32xi1>, vector<32x32xf32>
    %cst_24 = arith.constant dense<0xFF800000> : vector<32xf32>
    %57 = vector.multi_reduction <maximumf>, %56, %cst_24 [1] : vector<32x32xf32> to vector<32xf32>
    %58 = vector.shape_cast %57 : vector<32xf32> to vector<32x1xf32>
    %59 = vector.broadcast %58 : vector<32x1xf32> to vector<32x32xf32>
    %60 = arith.subf %56, %59 : vector<32x32xf32>
    %61 = math.exp %60 : vector<32x32xf32>
    %cst_25 = arith.constant dense<0.000000e+00> : vector<32xf32>
    %62 = vector.multi_reduction <add>, %61, %cst_25 [1] : vector<32x32xf32> to vector<32xf32>
    %63 = vector.shape_cast %62 : vector<32xf32> to vector<32x1xf32>
    %cst_26 = arith.constant dense<0.000000e+00> : vector<32x16xf32>
    %64 = tpu.matmul %61, %53, %cst_26 {dimension_numbers = #tpu.dot_dimension_numbers<[1], [0], [0], [1], [0, 0, 1, 1], [], []>} : vector<32x32xf32>, vector<32x16xf32>, vector<32x16xf32> -> vector<32x16xf32>
    %65 = tpu.reciprocal %63 : vector<32x1xf32> -> vector<32x1xf32>
    %66 = vector.broadcast %65 : vector<32x1xf32> to vector<32x16xf32>
    %67 = arith.mulf %64, %66 : vector<32x16xf32>
    %c2 = arith.constant 2 : index
    %c0_27 = arith.constant 0 : index
    %c0_28 = arith.constant 0 : index
    %68 = vector.load %arg3[%c2, %c0_27, %c0_28] : memref<4x16x64xf32, #tpu.memory_space<vmem>>, vector<1x16x64xf32>
    %69 = vector.shape_cast %68 : vector<1x16x64xf32> to vector<16x64xf32>
    %cst_29 = arith.constant dense<0.000000e+00> : vector<32x64xf32>
    %70 = tpu.matmul %67, %69, %cst_29 {dimension_numbers = #tpu.dot_dimension_numbers<[1], [0], [0], [1], [0, 0, 1, 1], [], []>} : vector<32x16xf32>, vector<16x64xf32>, vector<32x64xf32> -> vector<32x64xf32>
    %71 = arith.addf %50, %70 : vector<32x64xf32>
    %72 = vector.extract_strided_slice %2 {offsets = [0, 48], sizes = [32, 16], strides = [1, 1]} : vector<32x192xf32> to vector<32x16xf32>
    %73 = vector.extract_strided_slice %2 {offsets = [0, 112], sizes = [32, 16], strides = [1, 1]} : vector<32x192xf32> to vector<32x16xf32>
    %74 = vector.extract_strided_slice %2 {offsets = [0, 176], sizes = [32, 16], strides = [1, 1]} : vector<32x192xf32> to vector<32x16xf32>
    "tpu.trace_start"() <{level = 10 : i32, message = "qd,kd->qk"}> : () -> ()
    %cst_30 = arith.constant dense<0.000000e+00> : vector<32x32xf32>
    %75 = tpu.matmul %72, %73, %cst_30 {dimension_numbers = #tpu.dot_dimension_numbers<[1], [1], [0], [0], [0, 0, 1, 0], [], []>} : vector<32x16xf32>, vector<32x16xf32>, vector<32x32xf32> -> vector<32x32xf32>
    %cst_31 = arith.constant 0xFF800000 : f32
    "tpu.trace_stop"() : () -> ()
    %76 = vector.broadcast %cst_31 : f32 to vector<32x32xf32>
    %77 = arith.select %5, %75, %76 : vector<32x32xi1>, vector<32x32xf32>
    %cst_32 = arith.constant dense<0xFF800000> : vector<32xf32>
    %78 = vector.multi_reduction <maximumf>, %77, %cst_32 [1] : vector<32x32xf32> to vector<32xf32>
    %79 = vector.shape_cast %78 : vector<32xf32> to vector<32x1xf32>
    %80 = vector.broadcast %79 : vector<32x1xf32> to vector<32x32xf32>
    %81 = arith.subf %77, %80 : vector<32x32xf32>
    %82 = math.exp %81 : vector<32x32xf32>
    %cst_33 = arith.constant dense<0.000000e+00> : vector<32xf32>
    %83 = vector.multi_reduction <add>, %82, %cst_33 [1] : vector<32x32xf32> to vector<32xf32>
    %84 = vector.shape_cast %83 : vector<32xf32> to vector<32x1xf32>
    %cst_34 = arith.constant dense<0.000000e+00> : vector<32x16xf32>
    %85 = tpu.matmul %82, %74, %cst_34 {dimension_numbers = #tpu.dot_dimension_numbers<[1], [0], [0], [1], [0, 0, 1, 1], [], []>} : vector<32x32xf32>, vector<32x16xf32>, vector<32x16xf32> -> vector<32x16xf32>
    %86 = tpu.reciprocal %84 : vector<32x1xf32> -> vector<32x1xf32>
    %87 = vector.broadcast %86 : vector<32x1xf32> to vector<32x16xf32>
    %88 = arith.mulf %85, %87 : vector<32x16xf32>
    %c3 = arith.constant 3 : index
    %c0_35 = arith.constant 0 : index
    %c0_36 = arith.constant 0 : index
    %89 = vector.load %arg3[%c3, %c0_35, %c0_36] : memref<4x16x64xf32, #tpu.memory_space<vmem>>, vector<1x16x64xf32>
    %90 = vector.shape_cast %89 : vector<1x16x64xf32> to vector<16x64xf32>
    %cst_37 = arith.constant dense<0.000000e+00> : vector<32x64xf32>
    %91 = tpu.matmul %88, %90, %cst_37 {dimension_numbers = #tpu.dot_dimension_numbers<[1], [0], [0], [1], [0, 0, 1, 1], [], []>} : vector<32x16xf32>, vector<16x64xf32>, vector<32x64xf32> -> vector<32x64xf32>
    %92 = arith.addf %71, %91 : vector<32x64xf32>
    %c0_38 = arith.constant 0 : index
    %c0_39 = arith.constant 0 : index
    %93 = vector.load %arg5[%c0_38, %c0_39] : memref<32x64xf32, #tpu.memory_space<vmem>>, vector<32x64xf32>
    tpu.vector_store %arg5[%c0_38, %c0_39], %92 {strides = array<i32>} : memref<32x64xf32, #tpu.memory_space<vmem>>, vector<32x64xf32>,
    return
  }
  func.func @transform_0(%arg0: i32) -> (i32, i32) {
    %c0_i32 = arith.constant 0 : i32
    %c0_i32_0 = arith.constant 0 : i32
    return %arg0, %c0_i32 : i32, i32
  }
  func.func @transform_1(%arg0: i32) -> (i32, i32) {
    %c0_i32 = arith.constant 0 : i32
    %c0_i32_0 = arith.constant 0 : i32
    %c0_i32_1 = arith.constant 0 : i32
    return %c0_i32, %c0_i32_0 : i32, i32
  }
  func.func @transform_2(%arg0: i32) -> (i32, i32, i32) {
    %c0_i32 = arith.constant 0 : i32
    %c0_i32_0 = arith.constant 0 : i32
    %c0_i32_1 = arith.constant 0 : i32
    %c0_i32_2 = arith.constant 0 : i32
    return %c0_i32, %c0_i32_0, %c0_i32_1 : i32, i32, i32
  }
  func.func @transform_3(%arg0: i32) -> (i32, i32) {
    %c0_i32 = arith.constant 0 : i32
    %c0_i32_0 = arith.constant 0 : i32
    %c0_i32_1 = arith.constant 0 : i32
    return %c0_i32, %c0_i32_0 : i32, i32
  }
  func.func @transform_4(%arg0: i32) -> (i32, i32) {
    %c0_i32 = arith.constant 0 : i32
    %c0_i32_0 = arith.constant 0 : i32
    return %arg0, %c0_i32 : i32, i32
  }
}

</mosaic_0001>

<bundles_post_ra>
// kernel: tpu_custom_call.1
= control target key start
LH: loop header
LB: loop body
LE: loop exit
PB: predicated region body
PF: predicated region fallthrough
CT: control target
= control target key end

     0   :  { %9 = vsyncpa [#allocation3], 0  ;;  %s3407_s0 = inlined_call_operand.hbm [shape: f32[64,64], index: 0, kind: input, shape index: {}]   ;;  %s3408_s1 = inlined_call_operand.hbm [shape: f32[64,192], index: 1, kind: input, shape index: {}]   ;;  %s3409_s2 = inlined_call_operand.hbm [shape: f32[4,16,64], index: 2, kind: input, shape index: {}]   ;;  %s3410_s3 = inlined_call_operand.vmem [shape: f32[1,64], index: 3, kind: input, shape index: {}]   ;;  %s3411_s4 = inlined_call_operand.hbm [shape: f32[64,64], index: 4, kind: output, shape index: {}]  }
   0x1   :  { %11 = vsyncpa [#allocation3 + $0x1], 0 }
   0x2   :  { %12 = vsyncpa [#allocation6], 0 }
   0x3   :  { %13 = vsyncpa [#allocation4], 0 }
   0x4   :  { %15 = vsyncpa [#allocation4 + $0x1], 0  ;;  %s2875_s15 = smov 0   ;;  %s2877_s16 = smov 0  }
   0x5   :  { %s2879_s17 = smov 0   ;;  %s2881_s18 = smov 0  }
   0x6 LB: > { %s2896_s19 = sadd.s32 4294967295, %s2830_s18   ;;  %s1998_s20 = sadd.s32 4294967294, %s2830_s18   ;;  %s2830_s18 = sphi %s2881_s18, %s3433_s18   ;;  %s2826_s17 = sphi %s2879_s17, %s3432_s17   ;;  %s2822_s16 = sphi %s2877_s16, %s3431_s16   ;;  %s2818_s15 = sphi %s2875_s15, %s3430_s15  }
   0x7   : > { %p41_p0 = scmp.ne.s32.totalorder %s2822_s16, %s2818_s15  ;;  %p3412_p1 = scmp.eq.s32.totalorder %s2896_s19, 0 }
   0x8   : > { %p134_p3 = scmp.eq.s32.totalorder %s1998_s20, 1  ;;  %p1999_p5 = scmp.ge.s32.totalorder %s2830_s18, 1 }
   0x9   : > { %p2905_p4 = por %p3412_p1, %p41_p0  ;;  %p141_p7 = scmp.lt.s32.totalorder %s2830_s18, 3 }
   0xa   : > { %p2910_p6 = por %p134_p3, %p41_p0  ;;  %s2832_s24 = smov [#allocation5]  }
   0xb   : > { %s3415_s21 = scalar_select %p2905_p4, 1, 0 }
   0xc   : > { %s3416_s22 = scalar_select %p2910_p6, 1, 0 }
   0xd   : > { %p2915_p8 = pnand %p1999_p5, %p141_p7  ;;  %s153_s25 = sshll.u32 %s2832_s24, 4  ;;  %s2919_s25 = int_to_ptr.vmem [resolvable:$true] %s153_s25 }
   0xe   : > { %s2833_s27 = smov [#allocation7]   ;;  %s2674_s5 = scalar_lea.hbm %s3408_s1, 2048 }
   0xf   : > { %p2471_p9 = pneg %p2915_p8  ;;  %s166_s28 = sshll.u32 %s2833_s27, 4  ;;  %s2930_s28 = int_to_ptr.vmem [resolvable:$true] %s166_s28 }
  0x10   : > { %p2675_p12 = scmp.ne.s32.totalorder %s3408_s1, %s2674_s5  ;;  %p2681_p5 = scmp.lt.u32.totalorder %s2674_s5, %s3408_s1 }
  0x11   : > { %p2926_p11 = pnand %p2471_p9, %p3412_p1 }
  0x13   : > { %p2676_p13 = pneg %p2926_p11 }
  0x15   : > { %p2677_p0 = pnand %p2676_p13, %p2675_p12 }
  0x17   : > { %p2678_p3 = pneg %p2677_p0 }
  0x19   : > { %p2683_p7 = pnand %p2681_p5, %p2678_p3 }
  0x1b   : > { %2686 = shalt.err (!%p2683_p7)
}
  0x1c   : > { %s2687_s10 = scalar_lea.vmem %s2919_s25, 2048  ;;  %p2695_p2 = scmp.lt.s32.totalorder %s2919_s25, %s2919_s25 }
  0x1d   : > { %p2688_p9 = scmp.ne.s32.totalorder %s2919_s25, %s2687_s10  ;;  %p2696_p12 = scmp.lt.s32.totalorder %s2687_s10, %s2687_s10 }
  0x1f   : > { %p2690_p10 = pnand %p2688_p9, %p2676_p13  ;;  %p2697_p0 = por %p2696_p12, %p2695_p2 }
  0x21   : > { %p2691_p1 = pneg %p2690_p10 }
  0x23   : > { %p2698_p6 = pnand %p2697_p0, %p2691_p1 }
  0x25   : > { %2701 = shalt.err (!%p2698_p6)
}
  0x26   : > { %s2834_s11 = smov 256   ;;  %s2835_s12 = smov 16  }
  0x27   : > { %2474 = dma.hbm_to_vmem [thread:$0]  (!%p2926_p11), %s3408_s1, 2048, %s2919_s25, [#allocation6], %s2834_s11, %s2834_s11, %s2835_s12  }
  0x28   : > { %s2702_s27 = scalar_lea.hbm %s3409_s2, 1024 }
  0x29   : > { %p2703_p2 = scmp.ne.s32.totalorder %s3409_s2, %s2702_s27  ;;  %p2709_p10 = scmp.lt.u32.totalorder %s2702_s27, %s3409_s2 }
  0x2b   : > { %p2705_p1 = pnand %p2703_p2, %p2676_p13 }
  0x2d   : > { %p2706_p6 = pneg %p2705_p1 }
  0x2f   : > { %p2711_p3 = pnand %p2709_p10, %p2706_p6 }
  0x31   : > { %2714 = shalt.err (!%p2711_p3)
}
  0x32   : > { %s2715_s25 = scalar_lea.vmem %s2930_s28, 1024  ;;  %p2723_p12 = scmp.lt.s32.totalorder %s2930_s28, %s2930_s28 }
  0x33   : > { %p2716_p5 = scmp.ne.s32.totalorder %s2930_s28, %s2715_s25  ;;  %p2724_p0 = scmp.lt.s32.totalorder %s2715_s25, %s2715_s25 }
  0x35   : > { %p2718_p7 = pnand %p2716_p5, %p2676_p13  ;;  %p2725_p2 = por %p2724_p0, %p2723_p12 }
  0x37   : > { %p2719_p9 = pneg %p2718_p7 }
  0x39   : > { %p2726_p1 = pnand %p2725_p2, %p2719_p9 }
  0x3b   : > { %2729 = shalt.err (!%p2726_p1)
}
  0x3c   : > { %s2836_s7 = smov 128   ;;  %s2837_s8 = smov 8  }
  0x3d   : > { %2477 = dma.hbm_to_vmem [thread:$0]  (!%p2926_p11), %s3409_s2, 1024, %s2930_s28, [#allocation6], %s2836_s7, %s2836_s7, %s2837_s8  }
  0x3e   : > { %s2988_s11 = sadd.s32 1, %s2830_s18   ;;  %s28_s13 = sadd.s32 1, %s2826_s17 }
  0x3f   : > { %s25_s12 = ssub.s32 %s2830_s18, %s2988_s11  ;;  %p35_p6 = scmp.ne.s32.totalorder %s2826_s17, %s2822_s16 }
  0x40   : > { %p26_p13 = scmp.eq.s32.totalorder %s25_s12, 0  ;;  %p36_p10 = scmp.eq.s32.totalorder %s2830_s18, 0 }
  0x41   : > { %p3419_p5 = scmp.eq.s32.totalorder %s2896_s19, 1  ;;  %p2488_p9 = scmp.lt.s32.totalorder %s2830_s18, 2 }
  0x42   : > { %s2997_s14 = scalar_select %p26_p13, %s2826_s17, %s28_s13  }
  0x43   : > { %p37_p3 = por %p36_p10, %p35_p6  ;;  %p3001_p7 = por %p3419_p5, %p35_p6 }
  0x44   : > { %s183_s20 = sand.u32 1, %s2826_s17   ;;  %s2085_s28 = sshll.u32 %s2830_s18, 9 }
  0x45   : > { %s3420_s26 = scalar_select %p3001_p7, 1, 0 }
  0x46   : > { %s2003_s24 = sshll.u32 %s183_s20, 5  ;;  %s3011_s30 = scalar_lea.hbm %s3407_s0, %s2085_s28 }
  0x47   : > { %s187_s5 = scalar_lea.vmem [#allocation2], %s2003_s24  ;;  %p3015_p11 = pnand %p2488_p9, %p37_p3 }
  0x48   : > { %s194_s6 = sshll.u32 %s187_s5, 4  ;;  %s3019_s9 = scalar_lea.sflag [#allocation3], %s183_s20  ;;  %s3013_s6 = int_to_ptr.vmem [resolvable:$true] %s194_s6 }
  0x49   : > { %s2730_s10 = scalar_lea.hbm %s3011_s30, 512  ;;  %p2732_p0 = pneg %p3015_p11 }
  0x4a   : > { %p2731_p12 = scmp.ne.s32.totalorder %s3011_s30, %s2730_s10  ;;  %s2735_s24 = scalar_lea.hbm %s3407_s0, 1024 }
  0x4b   : > { %p2736_p13 = scmp.lt.u32.totalorder %s3011_s30, %s3407_s0  ;;  %p2737_p6 = scmp.lt.u32.totalorder %s2735_s24, %s2730_s10 }
  0x4c   : > { %p2733_p2 = pnand %p2732_p0, %p2731_p12  ;;  %p2739_p3 = scmp.lt.u32.totalorder %s2730_s10, %s3011_s30 }
  0x4d   : > { %p2738_p10 = por %p2737_p6, %p2736_p13 }
  0x4e   : > { %p2734_p1 = pneg %p2733_p2 }
  0x4f   : > { %p2740_p5 = por %p2739_p3, %p2738_p10 }
  0x51   : > { %p2741_p9 = pnand %p2740_p5, %p2734_p1 }
  0x53   : > { %2744 = shalt.err (!%p2741_p9)
}
  0x54   : > { %s2745_s20 = scalar_lea.vmem %s3013_s6, 512  ;;  %s2838_s29 = smov [#allocation2]  }
  0x55   : > { %p2746_p12 = scmp.ne.s32.totalorder %s3013_s6, %s2745_s20  ;;  %s2750_s5 = sshll.u32 %s2838_s29, 4  ;;  %s2751_s5 = int_to_ptr.vmem [resolvable:$false] %s2750_s5 }
  0x56   : > { %s2752_s12 = scalar_lea.vmem %s2751_s5, 1024  ;;  %p2753_p4 = scmp.lt.s32.totalorder %s3013_s6, %s2751_s5 }
  0x57   : > { %p2748_p2 = pnand %p2746_p12, %p2732_p0  ;;  %p2754_p13 = scmp.lt.s32.totalorder %s2752_s12, %s2745_s20 }
  0x59   : > { %p2749_p7 = pneg %p2748_p2  ;;  %p2755_p6 = por %p2754_p13, %p2753_p4 }
  0x5b   : > { %p2756_p10 = pnand %p2755_p6, %p2749_p7 }
  0x5d   : > { %2759 = shalt.err (!%p2756_p10)
}
  0x5e   : > { %2481 = dma.hbm_to_vmem [thread:$0]  (!%p3015_p11), %s3011_s30, 512, %s3013_s6, %s3019_s9, %s2836_s7, %s2836_s7, %s2837_s8  }
  0x5f   : > { %206 = sbr.rel (%p2915_p8) target bundleno = 2145 (0x861), region = 36  ;;  %s3053_s10 = sand.u32 (!%p2915_p8), 1, %s2822_s16  }
  0x60   : > { %s2007_s13 = sshll.u32 (!%p2915_p8), %s3053_s10, 5  ;;  %s209_s24 = scalar_lea.sflag (!%p2915_p8), [#allocation3], %s3053_s10 }
  0x61   : > { %s3059_s25 = scalar_lea.vmem (!%p2915_p8), [#allocation2], %s2007_s13  ;;  %p3422_p4 = scmp.ne.s32.totalorder (!%p2915_p8), %s3415_s21, 0 }
  0x66   : > { %2805 = dma.done.wait (%p3422_p4), %s209_s24, 512  }
  0x67   : > { %2807 = vsyncadd (%p3422_p4), %s209_s24, 4294966784  ;;  %p3423_p7 = scmp.eq.s32.totalorder %s2896_s19, 0 }
  0x69   : > { %2809 = dma.done.wait (%p3423_p7), [#allocation6], 3072   ;;  %p3424_p8 = pmov %p3423_p7 }
  0x6a   : > { %v2839_v0 = vmov 0.0   ;;  %v252_v1 = vld [vmem:[#allocation5 + $0x8] sm:$0xff]  ;;  %v254_v2 = vld [vmem:[#allocation5 + $0x18] sm:$0xff]  ;;  %v251_v3 = vld [vmem:[#allocation5] sm:$0xff]  ;;  %vm267_vm0 = vcmask 523264   ;;  %vm399_vm1 = vcmask 130048   ;;  %v369_v52 = vlaneseq }
  0x6b   : > { %2811 = vsyncadd (%p3424_p8), [#allocation6], 4294964224  ;;  %344 = vmatprep.mubr.f32.mxu0 %v2839_v0  ;;  %v2327_v4 = vpack.c.bf16 %v254_v2, %v252_v1  ;;  %v253_v5 = vld [vmem:[#allocation5 + $0x10] sm:$0xff]  ;;  %v256_v6 = vld [vmem:[#allocation5 + $0x28] sm:$0xff]  ;;  %s2840_s21 = smov 64   ;;  %vm505_vm4 = vcmask 261120  }
  0x6c   : > { %v258_v7 = vld [vmem:[#allocation5 + $0x38] sm:$0xff]  ;;  %v2329_v8 = vpack.c.bf16 %v253_v5, %v251_v3  ;;  %v255_v10 = vld [vmem:[#allocation5 + $0x20] sm:$0xff]  ;;  %v257_v11 = vld [vmem:[#allocation5 + $0x30] sm:$0xff]  ;;  %v3121_v53 = vshrl.u32 %v369_v52, 7  ;;  %v3126_v55 = vand.u32 127, %v369_v52  ;;  %s2841_s23 = smov 48  }
  0x6d   : > { %v2331_v9 = vpack.c.bf16 %v258_v7, %v256_v6  ;;  %v260_v12 = vld [vmem:[#allocation5 + $0x48] sm:$0xff]  ;;  %2328 = vmatprep.subr.bf16.mxu0 %v2327_v4  ;;  %v262_v13 = vld [vmem:[#allocation5 + $0x58] sm:$0xff]  ;;  %v2333_v14 = vpack.c.bf16 %v257_v11, %v255_v10  ;;  %v259_v16 = vld [vmem:[#allocation5 + $0x40] sm:$0xff]  ;;  %s2842_s7 = smov 112   ;;  %s2843_s8 = smov 96  }
  0x6e   : > { %2330 = vmatpush1.bf16.msra.mxu0 %v2329_v8  ;;  %v2335_v15 = vpack.c.bf16 %v262_v13, %v260_v12  ;;  %v261_v17 = vld [vmem:[#allocation5 + $0x50] sm:$0xff]  ;;  %v264_v18 = vld [vmem:[#allocation5 + $0x68] sm:$0xff]  ;;  %v266_v19 = vld [vmem:[#allocation5 + $0x78] sm:$0xff]  ;;  %v3124_v54 = vadd.s32 8, %v3121_v53  ;;  %v3131_v56 = vadd.s32 16, %v3121_v53  ;;  %vm376_vm5 = vcmp.ge.s32.totalorder %v3121_v53, %v3126_v55  ;;  %s2844_s30 = smov 32  }
  0x6f   : > { %2332 = vmatprep.subr.bf16.mxu0 %v2331_v9  ;;  %v2337_v20 = vpack.c.bf16 %v261_v17, %v259_v16  ;;  %v2339_v21 = vpack.c.bf16 %v266_v19, %v264_v18  ;;  %v263_v22 = vld [vmem:[#allocation5 + $0x60] sm:$0xff]  ;;  %v265_v23 = vld [vmem:[#allocation5 + $0x70] sm:$0xff]  ;;  %v248_v26 = vld [vmem:[%s3059_s25 + $0x8] sm:$0xff]  ;;  %v3136_v58 = vadd.s32 24, %v3121_v53  ;;  %s2845_s6 = smov 16   ;;  %s2846_s9 = smov 80  }
  0x70   : > { %v2341_v24 = vpack.c.bf16 %v265_v23, %v263_v22  ;;  %v247_v25 = vld [vmem:[%s3059_s25] sm:$0xff]  ;;  %v249_v27 = vld [vmem:[%s3059_s25 + $0x10] sm:$0xff]  ;;  %v250_v28 = vld [vmem:[%s3059_s25 + $0x18] sm:$0xff]  ;;  %vm377_vm3 = vcmp.ge.s32.totalorder %v3124_v54, %v3126_v55  ;;  %vm378_vm6 = vcmp.ge.s32.totalorder %v3131_v56, %v3126_v55  ;;  %s244_s20 = scalar_lea.vmem [#allocation8], %s2007_s13  ;;  %s2086_s5 = sshll.u32 %s2896_s19, 9 }
  0x71   : > { %vm3103_vm2 = vmpackc.low %vm399_vm1, %vm399_vm1  ;;  %vm379_vm7 = vcmp.ge.s32.totalorder %v3136_v58, %v3126_v55  ;;  %v1407_v55 = vld [vmem:[#allocation7 + $0x20] sm:$0xff]  ;;  %v1408_v56 = vld [vmem:[#allocation7 + $0x28] sm:$0xff]  ;;  %s1906_s29 = sshll.u32 %s244_s20, 4  ;;  %s3361_s13 = scalar_lea.hbm %s3411_s4, %s2086_s5  ;;  %s3355_s29 = int_to_ptr.vmem [resolvable:$true] %s1906_s29 }
  0x72   : > { %2334 = vmatpush1.bf16.msra.mxu0 %v2333_v14  ;;  %s1893_s19 = scalar_lea.sflag [#allocation4], %s3053_s10  ;;  %s2760_s25 = scalar_lea.vmem %s3355_s29, 512 }
  0x73   : > { %2336 = vmatprep.subr.bf16.mxu0 %v2335_v15  ;;  %p2761_p11 = scmp.ne.s32.totalorder %s3355_s29, %s2760_s25  ;;  %p3427_p0 = scmp.ne.s32.totalorder %s3420_s26, 0 }
  0x75   : > { %p2762_p1 = pnand %p2761_p11, %p3427_p0 }
  0x76   : > { %2338 = vmatpush1.bf16.msra.mxu0 %v2337_v20 }
  0x77   : > { %2340 = vmatprep.subr.bf16.mxu0 %v2339_v21  ;;  %p2763_p3 = pneg %p2762_p1 }
  0x7a   : > { %2342 = vmatpush1.bf16.msra.mxu0 %v2341_v24 }
  0x7d   : > { %2011 = vmatmul.mubr.msk.f32.vlgmr.msra.gmra.mrb[0].mxu0 %vm267_vm0, %v247_v25 }
  0x7e   : > { %350 = vmatprep.mubr.f32.mxu0 %v2839_v0 }
  0x81   : > { %2012 = vmatmul.mubr.msk.f32.gmra.mrb[2].mxu0 %vm267_vm0, %v248_v26 }
  0x82   : > { %356 = vmatprep.mubr.f32.mxu0 %v2839_v0 }
  0x85   : > { %2013 = vmatmul.mubr.msk.f32.gmra.mrb[4].mxu0 %vm267_vm0, %v249_v27 }
  0x86   : > { %362 = vmatprep.mubr.f32.mxu0 %v2839_v0 }
  0x89   : > { %2014 = vmatmul.mubr.msk.f32.gmra.mrb[6].mxu0 %vm267_vm0, %v250_v28 }
 0x150   : > { %v3077_v29 = vpop.f32.mrb[0].mxu0 }
 0x151   : > { %v348_v30 = vpop.f32.mrb[1].mxu0  ;;  %2183 = vmatprep.mubr.msk.f32.mxu1 %vm399_vm1, %v3077_v29 }
 0x154   : > { %v3081_v31 = vpop.f32.mrb[2].mxu0 }
 0x155   : > { %v354_v32 = vpop.f32.mrb[3].mxu0  ;;  %v3085_v33 = vpack.i.bf16 %v3081_v31, %v3077_v29 }
 0x156   : > { %v2355_v34 = vpack.c.bf16 %v354_v32, %v348_v30  ;;  %v3087_v35 = vpack.i.bf16 %v354_v32, %v348_v30 }
 0x157   : > { %2541 = vrot.lane.b32.xlu0 %v3085_v33, %s2840_s21 }
 0x158   : > { %v3090_v36 = vpop.f32.mrb[4].mxu0 }
 0x159   : > { %v360_v37 = vpop.f32.mrb[5].mxu0 }
 0x15c   : > { %v3092_v38 = vpop.f32.mrb[6].mxu0 }
 0x15d   : > { %v366_v39 = vpop.f32.mrb[7].mxu0  ;;  %v3096_v40 = vpack.i.bf16 %v3092_v38, %v3090_v36 }
 0x15e   : > { %v2359_v41 = vpack.c.bf16 %v366_v39, %v360_v37  ;;  %v3098_v42 = vpack.i.bf16 %v366_v39, %v360_v37 }
 0x15f   : > { %2546 = vrot.lane.b32.xlu0 %v3096_v40, %s2840_s21  ;;  %s2847_s21 = smov [#allocation8]  }
 0x1c9   : > { %v2542_v43 = vpop.permute.xlu0 %2541 }
 0x1ca   : > { %v2544_v44 = vunpack.i.h.bf16 %v2542_v43  ;;  %v2543_v45 = vunpack.i.l.bf16 %v2542_v43 }
 0x1cc   : > { %v2343_v47 = vpack.c.bf16 %v2544_v44, %v2543_v45 }
 0x1ce   : > { %2345 = vmatprep.subr.msk.bf16.mxu1 %vm3103_vm2, %v2343_v47 }
 0x1cf   : > { %2348 = vmatpush3.bf16.xpose.msk.msra.mxu1 %vm3103_vm2, %v2343_v47 }
 0x1d1   : > { %v2547_v48 = vpop.permute.xlu0 %2546 }
 0x1d2   : > { %v2549_v49 = vunpack.i.h.bf16 %v2547_v48  ;;  %v2548_v50 = vunpack.i.l.bf16 %v2547_v48 }
 0x1d4   : > { %v2349_v51 = vpack.c.bf16 %v2549_v49, %v2548_v50 }
 0x1d6   : > { %2351 = vmatprep.subr.msk.bf16.mxu1 %vm3103_vm2, %v2349_v51 }
 0x1d7   : > { %2354 = vmatpush3.bf16.xpose.msk.msra.mxu1 %vm3103_vm2, %v2349_v51 }
 0x1d8   : > { %2356 = vmatprep.subr.bf16.mxu1 %v2355_v34 }
 0x1de   : > { %2184 = vmatmul.mubr.msk.f32.vlgmr.msra.gmra.mrb[0].mxu1 %vm399_vm1, %v3081_v31 }
 0x1df   : > { %2186 = vmatprep.mubr.msk.f32.mxu1 %vm399_vm1, %v3090_v36  ;;  %2358 = vmatpush3.bf16.msra.mxu1 %v2355_v34 }
 0x1e0   : > { %2360 = vmatprep.subr.bf16.mxu1 %v2359_v41 }
 0x1e2   : > { %2187 = vmatmul.mubr.msk.f32.gmra.mrb[2].mxu1 %vm399_vm1, %v3092_v38 }
 0x1e3   : > { %2362 = vmatpush3.bf16.msra.mxu1 %v2359_v41 }
 0x2b1   : > { %v2185_v57 = vpop.f32.mrb[0].mxu1 }
 0x2b2   : > { %v502_v59 = vsel %vm377_vm3, %v2185_v57, -inf  ;;  %v482_v60 = vpop.f32.mrb[1].mxu1 }
 0x2b3   : > { %v509_v61 = vsel %vm505_vm4, %v502_v59, -inf  ;;  %v501_v62 = vsel %vm376_vm5, %v482_v60, -inf }
 0x2b4   : > { %510 = vmax.xlane.f32.xlu1 %v509_v61  ;;  %v506_v2 = vsel %vm505_vm4, %v501_v62, -inf }
 0x2b5   : > { %v2188_v63 = vpop.f32.mrb[2].mxu1 }
 0x2b6   : > { %v492_v0 = vpop.f32.mrb[3].mxu1  ;;  %v504_v3 = vsel %vm379_vm7, %v2188_v63, -inf }
 0x2b7   : > { %v503_v1 = vsel %vm378_vm6, %v492_v0, -inf  ;;  %v515_v5 = vsel %vm505_vm4, %v504_v3, -inf  ;;  %v647_v0 = vld [vmem:[#allocation7] sm:$0xff] }
 0x2b8   : > { %507 = vmax.xlane.f32.xlu1 %v506_v2  ;;  %v512_v4 = vsel %vm505_vm4, %v503_v1, -inf }
 0x2b9   : > { %513 = vmax.xlane.f32.xlu0 %v512_v4 }
 0x2bc   : > { %516 = vmax.xlane.f32.xlu1 %v515_v5 }
 0x2cd   : > { %2551 = vrot.lane.b32.xlu1 %v3085_v33, %s2841_s23 }
 0x2cf   : > { %754 = vrot.lane.b32.xlu0 %v3090_v36, %s2842_s7 }
 0x2d1   : > { %2556 = vrot.lane.b32.xlu1 %v3096_v40, %s2841_s23  ;;  %s2764_s23 = sshll.u32 %s2847_s21, 4  ;;  %s2765_s23 = int_to_ptr.vmem [resolvable:$false] %s2764_s23 }
 0x2d2   : > { %p2767_p5 = scmp.lt.s32.totalorder %s3355_s29, %s2765_s23 }
 0x2d3   : > { %1136 = vrot.lane.b32.xlu0 %v3090_v36, %s2843_s8 }
 0x2d5   : > { %750 = vrot.lane.b32.xlu1 %v3077_v29, %s2842_s7 }
 0x2d9   : > { %752 = vrot.lane.b32.xlu1 %v3081_v31, %s2842_s7 }
 0x2dd   : > { %756 = vrot.lane.b32.xlu1 %v3092_v38, %s2842_s7 }
 0x2e1   : > { %2561 = vrot.lane.b32.xlu1 %v3085_v33, %s2844_s30 }
 0x2e5   : > { %2566 = vrot.lane.b32.xlu1 %v3096_v40, %s2844_s30 }
 0x2e9   : > { %1132 = vrot.lane.b32.xlu1 %v3077_v29, %s2843_s8 }
 0x2ed   : > { %1134 = vrot.lane.b32.xlu1 %v3081_v31, %s2843_s8 }
 0x2f1   : > { %1138 = vrot.lane.b32.xlu1 %v3092_v38, %s2843_s8 }
 0x341   : > { %v511_v6 = vpop.xlane.xlu1 %510 }
 0x342   : > { %v519_v7 = vsub.f32 %v502_v59, %v511_v6 }
 0x344   : > { %v524_v8 = vmul.f32 1.442695, %v519_v7 }
 0x345   : > { %v508_v9 = vpop.xlane.xlu1 %507 }
 0x346   : > { %2610 = vpow2.f32 %v524_v8  ;;  %v518_v10 = vsub.f32 %v501_v62, %v508_v9  ;;  %v514_v11 = vpop.xlane.xlu0 %513 }
 0x347   : > { %v520_v12 = vsub.f32 %v503_v1, %v514_v11  ;;  %v648_v1 = vld [vmem:[#allocation7 + $0x8] sm:$0xff] }
 0x348   : > { %v522_v13 = vmul.f32 1.442695, %v518_v10  ;;  %v2363_v2 = vpack.c.bf16 %v648_v1, %v647_v0 }
 0x349   : > { %v526_v14 = vmul.f32 1.442695, %v520_v12  ;;  %v517_v15 = vpop.xlane.xlu1 %516 }
 0x34a   : > { %2612 = vpow2.f32 %v522_v13  ;;  %v521_v16 = vsub.f32 %v504_v3, %v517_v15  ;;  %v755_v51 = vpop.permute.xlu0 %754  ;;  %2364 = vmatprep.subr.bf16.mxu0 %v2363_v2 }
 0x34b   : > { %2614 = vpow2.f32 %v526_v14  ;;  %2366 = vmatpush3.bf16.msra.mxu0 %v2363_v2 }
 0x34c   : > { %v528_v17 = vmul.f32 1.442695, %v521_v16 }
 0x34d   : > { %v2552_v18 = vpop.permute.xlu1 %2551 }
 0x34e   : > { %2616 = vpow2.f32 %v528_v17  ;;  %v2554_v19 = vunpack.i.h.bf16 %v2552_v18  ;;  %v2553_v20 = vunpack.i.l.bf16 %v2552_v18  ;;  %v1137_v62 = vpop.permute.xlu0 %1136 }
 0x350   : > { %v2611_v21 = vpop.eup %2610  ;;  %v2367_v22 = vpack.c.bf16 %v2554_v19, %v2553_v20 }
 0x351   : > { %v2557_v23 = vpop.permute.xlu1 %2556  ;;  %v533_v24 = vsel %vm505_vm4, %v2611_v21, 0.0 }
 0x352   : > { %v2559_v25 = vunpack.i.h.bf16 %v2557_v23  ;;  %v2558_v26 = vunpack.i.l.bf16 %v2557_v23  ;;  %534 = vadd.xlane.f32.xlu1 %v533_v24  ;;  %2369 = vmatprep.subr.msk.bf16.mxu1 %vm3103_vm2, %v2367_v22 }
 0x354   : > { %v2613_v27 = vpop.eup %2612  ;;  %v2373_v28 = vpack.c.bf16 %v2559_v25, %v2558_v26 }
 0x355   : > { %v2615_v30 = vpop.eup %2614  ;;  %2197 = vmatprep.mubr.msk.f32.mxu1 %vm505_vm4, %v2613_v27  ;;  %v751_v32 = vpop.permute.xlu1 %750  ;;  %v530_v34 = vsel %vm505_vm4, %v2613_v27, 0.0 }
 0x356   : > { %531 = vadd.xlane.f32.xlu0 %v530_v34  ;;  %2198 = vmatmul.mubr.msk.f32.vlgmr.msra.gmra.mrb[4].mxu1 %vm505_vm4, %v2611_v21  ;;  %v536_v44 = vsel %vm505_vm4, %v2615_v30, 0.0 }
 0x357   : > { %2372 = vmatpush3.bf16.xpose.msk.msra.mxu1 %vm3103_vm2, %v2367_v22  ;;  %2200 = vmatprep.mubr.msk.f32.mxu1 %vm505_vm4, %v2615_v30 }
 0x358   : > { %v2617_v37 = vpop.eup %2616  ;;  %2375 = vmatprep.subr.msk.bf16.mxu1 %vm3103_vm2, %v2373_v28 }
 0x359   : > { %v753_v39 = vpop.permute.xlu1 %752  ;;  %v539_v41 = vsel %vm505_vm4, %v2617_v37, 0.0 }
 0x35a   : > { %540 = vadd.xlane.f32.xlu0 %v539_v41  ;;  %2201 = vmatmul.mubr.msk.f32.gmra.mrb[6].mxu1 %vm505_vm4, %v2617_v37 }
 0x35b   : > { %2221 = vmatprep.mubr.msk.f32.mxu1 %vm399_vm1, %v751_v32 }
 0x35d   : > { %v757_v43 = vpop.permute.xlu1 %756 }
 0x35e   : > { %537 = vadd.xlane.f32.xlu0 %v536_v44 }
 0x35f   : > { %2378 = vmatpush3.bf16.xpose.msk.msra.mxu1 %vm3103_vm2, %v2373_v28 }
 0x361   : > { %v2562_v45 = vpop.permute.xlu1 %2561 }
 0x362   : > { %v2564_v47 = vunpack.i.h.bf16 %v2562_v45  ;;  %v2563_v48 = vunpack.i.l.bf16 %v2562_v45 }
 0x364   : > { %v2391_v49 = vpack.c.bf16 %v2564_v47, %v2563_v48 }
 0x365   : > { %v2567_v50 = vpop.permute.xlu1 %2566 }
 0x366   : > { %v2569_v52 = vunpack.i.h.bf16 %v2567_v50  ;;  %v2568_v57 = vunpack.i.l.bf16 %v2567_v50  ;;  %2222 = vmatmul.mubr.msk.f32.vlgmr.msra.gmra.mrb[8].mxu1 %vm399_vm1, %v753_v39  ;;  %2393 = vmatprep.subr.msk.bf16.mxu1 %vm3103_vm2, %v2391_v49 }
 0x367   : > { %2224 = vmatprep.mubr.msk.f32.mxu1 %vm399_vm1, %v755_v51  ;;  %2396 = vmatpush3.bf16.xpose.msk.msra.mxu1 %vm3103_vm2, %v2391_v49 }
 0x368   : > { %v2397_v59 = vpack.c.bf16 %v2569_v52, %v2568_v57 }
 0x369   : > { %v1133_v60 = vpop.permute.xlu1 %1132 }
 0x36a   : > { %2225 = vmatmul.mubr.msk.f32.gmra.mrb[10].mxu1 %vm399_vm1, %v757_v43  ;;  %2399 = vmatprep.subr.msk.bf16.mxu1 %vm3103_vm2, %v2397_v59 }
 0x36b   : > { %2259 = vmatprep.mubr.msk.f32.mxu1 %vm399_vm1, %v1133_v60 }
 0x36d   : > { %v1135_v61 = vpop.permute.xlu1 %1134 }
 0x36f   : > { %2402 = vmatpush3.bf16.xpose.msk.msra.mxu1 %vm3103_vm2, %v2397_v59 }
 0x371   : > { %v1139_v63 = vpop.permute.xlu1 %1138 }
 0x376   : > { %2260 = vmatmul.mubr.msk.f32.vlgmr.msra.gmra.mrb[12].mxu1 %vm399_vm1, %v1135_v61 }
 0x377   : > { %2262 = vmatprep.mubr.msk.f32.mxu1 %vm399_vm1, %v1137_v62 }
 0x37a   : > { %2263 = vmatmul.mubr.msk.f32.gmra.mrb[14].mxu1 %vm399_vm1, %v1139_v63 }
 0x3df   : > { %v535_v5 = vpop.xlane.xlu1 %534 }
 0x3e3   : > { %v532_v3 = vpop.xlane.xlu0 %531 }
 0x3e4   : > { %2618 = vrcp.f32 %v532_v3 }
 0x3e5   : > { %2620 = vrcp.f32 %v535_v5 }
 0x3e7   : > { %v541_v4 = vpop.xlane.xlu0 %540 }
 0x3eb   : > { %v538_v6 = vpop.xlane.xlu0 %537 }
 0x3ec   : > { %2622 = vrcp.f32 %v538_v6 }
 0x3ed   : > { %2624 = vrcp.f32 %v541_v4 }
 0x3ee   : > { %v2619_v8 = vpop.eup %2618 }
 0x3ef   : > { %v2621_v10 = vpop.eup %2620 }
 0x3f6   : > { %v2623_v14 = vpop.eup %2622 }
 0x3f7   : > { %v2625_v16 = vpop.eup %2624 }
 0x429   : > { %v2199_v7 = vpop.f32.mrb[4].mxu1 }
 0x42a   : > { %v620_v9 = vpop.f32.mrb[5].mxu1  ;;  %v644_v12 = vmul.f32 %v2621_v10, %v2199_v7 }
 0x42b   : > { %v643_v11 = vmul.f32 %v2619_v8, %v620_v9 }
 0x42d   : > { %v2202_v13 = vpop.f32.mrb[6].mxu1  ;;  %2207 = vmatprep.mubr.msk.f32.mxu0 %vm399_vm1, %v643_v11 }
 0x42e   : > { %v630_v15 = vpop.f32.mrb[7].mxu1  ;;  %2208 = vmatmul.mubr.msk.f32.vlgmr.msra.gmra.mrb[8].mxu0 %vm399_vm1, %v644_v12  ;;  %v646_v18 = vmul.f32 %v2625_v16, %v2202_v13 }
 0x42f   : > { %v645_v17 = vmul.f32 %v2623_v14, %v630_v15 }
 0x431   : > { %2210 = vmatprep.mubr.msk.f32.mxu0 %vm399_vm1, %v645_v17 }
 0x432   : > { %2211 = vmatmul.mubr.msk.f32.gmra.mrb[10].mxu0 %vm399_vm1, %v646_v18 }
 0x439   : > { %v2223_v19 = vpop.f32.mrb[8].mxu1 }
 0x43a   : > { %v868_v20 = vsel %vm377_vm3, %v2223_v19, -inf  ;;  %v848_v21 = vpop.f32.mrb[9].mxu1 }
 0x43b   : > { %v867_v22 = vsel %vm376_vm5, %v848_v21, -inf  ;;  %v874_v23 = vsel %vm505_vm4, %v868_v20, -inf }
 0x43c   : > { %875 = vmax.xlane.f32.xlu0 %v874_v23  ;;  %v871_v24 = vsel %vm505_vm4, %v867_v22, -inf }
 0x43d   : > { %872 = vmax.xlane.f32.xlu1 %v871_v24  ;;  %v2226_v25 = vpop.f32.mrb[10].mxu1 }
 0x43e   : > { %v870_v26 = vsel %vm379_vm7, %v2226_v25, -inf  ;;  %v858_v27 = vpop.f32.mrb[11].mxu1 }
 0x43f   : > { %v869_v28 = vsel %vm378_vm6, %v858_v27, -inf  ;;  %v880_v30 = vsel %vm505_vm4, %v870_v26, -inf  ;;  %v1030_v27 = vld [vmem:[#allocation7 + $0x18] sm:$0xff] }
 0x440   : > { %881 = vmax.xlane.f32.xlu0 %v880_v30  ;;  %v877_v32 = vsel %vm505_vm4, %v869_v28, -inf }
 0x441   : > { %878 = vmax.xlane.f32.xlu1 %v877_v32 }
 0x449   : > { %v2261_v34 = vpop.f32.mrb[12].mxu1 }
 0x44a   : > { %v1230_v37 = vpop.f32.mrb[13].mxu1  ;;  %v3247_v43 = vsel %vm377_vm3, %v2261_v34, -inf }
 0x44d   : > { %v2264_v39 = vpop.f32.mrb[14].mxu1 }
 0x44e   : > { %v1240_v41 = vpop.f32.mrb[15].mxu1 }
 0x452   : > { %2571 = vrot.lane.b32.xlu1 %v3087_v35, %s2842_s7 }
 0x456   : > { %2576 = vrot.lane.b32.xlu0 %v3098_v42, %s2842_s7  ;;  %2581 = vrot.lane.b32.xlu1 %v3085_v33, %s2845_s6  ;;  %v1256_v33 = vsel %vm505_vm4, %v3247_v43, -inf  ;;  %s2766_s7 = scalar_lea.vmem %s2765_s23, 1024 }
 0x457   : > { %p2768_p9 = scmp.lt.s32.totalorder %s2766_s7, %s2760_s25 }
 0x459   : > { %p2769_p12 = por %p2768_p9, %p2767_p5 }
 0x45a   : > { %1510 = vrot.lane.b32.xlu0 %v3077_v29, %s2846_s9  ;;  %2586 = vrot.lane.b32.xlu1 %v3096_v40, %s2845_s6  ;;  %v3254_v29 = vsel %vm379_vm7, %v2264_v39, -inf  ;;  %v3268_v40 = vsel %vm378_vm6, %v1240_v41, -inf }
 0x45b   : > { %v1259_v44 = vsel %vm505_vm4, %v3268_v40, -inf  ;;  %p2770_p2 = pnand %p2769_p12, %p2763_p3 }
 0x45e   : > { %1514 = vrot.lane.b32.xlu0 %v3090_v36, %s2846_s9  ;;  %1512 = vrot.lane.b32.xlu1 %v3081_v31, %s2846_s9  ;;  %v1262_v31 = vsel %vm505_vm4, %v3254_v29, -inf  ;;  %v3261_v36 = vsel %vm376_vm5, %v1230_v37, -inf }
 0x462   : > { %1516 = vrot.lane.b32.xlu1 %v3092_v38, %s2846_s9  ;;  %v1253_v38 = vsel %vm505_vm4, %v3261_v36, -inf }
 0x47d   : > { %1257 = vmax.xlane.f32.xlu0 %v1256_v33 }
 0x481   : > { %1263 = vmax.xlane.f32.xlu0 %v1262_v31 }
 0x486   : > { %1254 = vmax.xlane.f32.xlu1 %v1253_v38 }
 0x48a   : > { %1260 = vmax.xlane.f32.xlu1 %v1259_v44 }
 0x4c9   : > { %v876_v45 = vpop.xlane.xlu0 %875 }
 0x4ca   : > { %v884_v47 = vsub.f32 %v868_v20, %v876_v45  ;;  %v873_v48 = vpop.xlane.xlu1 %872 }
 0x4cb   : > { %v883_v49 = vsub.f32 %v867_v22, %v873_v48 }
 0x4cc   : > { %v889_v50 = vmul.f32 1.442695, %v884_v47 }
 0x4cd   : > { %v887_v51 = vmul.f32 1.442695, %v883_v49  ;;  %v882_v52 = vpop.xlane.xlu0 %881 }
 0x4ce   : > { %2626 = vpow2.f32 %v889_v50  ;;  %v886_v57 = vsub.f32 %v870_v26, %v882_v52  ;;  %v879_v59 = vpop.xlane.xlu1 %878  ;;  %v1029_v26 = vld [vmem:[#allocation7 + $0x10] sm:$0xff] }
 0x4cf   : > { %2628 = vpow2.f32 %v887_v51  ;;  %v885_v60 = vsub.f32 %v869_v28, %v879_v59  ;;  %v2387_v28 = vpack.c.bf16 %v1030_v27, %v1029_v26  ;;  %v2411_v26 = vpack.c.bf16 %v1408_v56, %v1407_v55 }
 0x4d0   : > { %v893_v61 = vmul.f32 1.442695, %v886_v57 }
 0x4d1   : > { %v891_v62 = vmul.f32 1.442695, %v885_v60  ;;  %v2577_v63 = vpop.permute.xlu0 %2576 }
 0x4d2   : > { %2630 = vpow2.f32 %v893_v61  ;;  %v2572_v0 = vpop.permute.xlu1 %2571  ;;  %v2579_v1 = vunpack.i.h.bf16 %v2577_v63  ;;  %v2578_v2 = vunpack.i.l.bf16 %v2577_v63 }
 0x4d3   : > { %v2574_v3 = vunpack.i.h.bf16 %v2572_v0  ;;  %v2573_v4 = vunpack.i.l.bf16 %v2572_v0  ;;  %2632 = vpow2.f32 %v891_v62 }
 0x4d4   : > { %v2383_v8 = vpack.c.bf16 %v2579_v1, %v2578_v2 }
 0x4d5   : > { %v2379_v5 = vpack.c.bf16 %v2574_v3, %v2573_v4  ;;  %v1511_v6 = vpop.permute.xlu0 %1510 }
 0x4d6   : > { %2297 = vmatprep.mubr.msk.f32.mxu1 %vm399_vm1, %v1511_v6  ;;  %v2582_v7 = vpop.permute.xlu1 %2581 }
 0x4d7   : > { %v2584_v9 = vunpack.i.h.bf16 %v2582_v7  ;;  %v2583_v10 = vunpack.i.l.bf16 %v2582_v7  ;;  %2380 = vmatprep.subr.bf16.mxu0 %v2379_v5 }
 0x4d8   : > { %v2627_v11 = vpop.eup %2626  ;;  %2382 = vmatpush3.bf16.msra.mxu0 %v2379_v5 }
 0x4d9   : > { %v2629_v12 = vpop.eup %2628  ;;  %v2415_v13 = vpack.c.bf16 %v2584_v9, %v2583_v10  ;;  %2384 = vmatprep.subr.bf16.mxu0 %v2383_v8  ;;  %v898_v14 = vsel %vm505_vm4, %v2627_v11, 0.0  ;;  %v1515_v25 = vpop.permute.xlu0 %1514 }
 0x4da   : > { %899 = vadd.xlane.f32.xlu1 %v898_v14  ;;  %v2587_v15 = vpop.permute.xlu1 %2586  ;;  %2235 = vmatprep.mubr.msk.f32.mxu0 %vm505_vm4, %v2629_v12  ;;  %v895_v16 = vsel %vm505_vm4, %v2629_v12, 0.0 }
 0x4db   : > { %v2589_v17 = vunpack.i.h.bf16 %v2587_v15  ;;  %v2588_v18 = vunpack.i.l.bf16 %v2587_v15  ;;  %896 = vadd.xlane.f32.xlu0 %v895_v16  ;;  %2417 = vmatprep.subr.msk.bf16.mxu1 %vm3103_vm2, %v2415_v13 }
 0x4dc   : > { %v2631_v19 = vpop.eup %2630  ;;  %2386 = vmatpush3.bf16.msra.mxu0 %v2383_v8  ;;  %2420 = vmatpush3.bf16.xpose.msk.msra.mxu1 %vm3103_vm2, %v2415_v13 }
 0x4dd   : > { %v2421_v20 = vpack.c.bf16 %v2589_v17, %v2588_v18  ;;  %v904_v21 = vsel %vm505_vm4, %v2631_v19, 0.0  ;;  %v2633_v22 = vpop.eup %2632  ;;  %2388 = vmatprep.subr.bf16.mxu0 %v2387_v28 }
 0x4de   : > { %v901_v23 = vsel %vm505_vm4, %v2633_v22, 0.0  ;;  %v1513_v24 = vpop.permute.xlu1 %1512 }
 0x4df   : > { %905 = vadd.xlane.f32.xlu0 %v904_v21  ;;  %2236 = vmatmul.mubr.msk.f32.vlgmr.msra.gmra.mrb[12].mxu0 %vm505_vm4, %v2627_v11 }
 0x4e0   : > { %2423 = vmatprep.subr.msk.bf16.mxu1 %vm3103_vm2, %v2421_v20  ;;  %2238 = vmatprep.mubr.msk.f32.mxu0 %vm505_vm4, %v2633_v22 }
 0x4e1   : > { %2390 = vmatpush3.bf16.msra.mxu0 %v2387_v28 }
 0x4e2   : > { %v1517_v30 = vpop.permute.xlu1 %1516 }
 0x4e3   : > { %902 = vadd.xlane.f32.xlu0 %v901_v23  ;;  %2239 = vmatmul.mubr.msk.f32.gmra.mrb[14].mxu0 %vm505_vm4, %v2631_v19 }
 0x4e4   : > { %2426 = vmatpush3.bf16.xpose.msk.msra.mxu1 %vm3103_vm2, %v2421_v20 }
 0x4eb   : > { %2591 = vrot.lane.b32.xlu1 %v3087_v35, %s2843_s8  ;;  %2298 = vmatmul.mubr.msk.f32.vlgmr.msra.gmra.mrb[16].mxu1 %vm399_vm1, %v1513_v24 }
 0x4ec   : > { %2300 = vmatprep.mubr.msk.f32.mxu1 %vm399_vm1, %v1515_v25 }
 0x4ef   : > { %2301 = vmatmul.mubr.msk.f32.gmra.mrb[18].mxu1 %vm399_vm1, %v1517_v30 }
 0x4f9   : > { %2596 = vrot.lane.b32.xlu0 %v3098_v42, %s2843_s8 }
 0x50a   : > { %v1258_v31 = vpop.xlane.xlu0 %1257 }
 0x50b   : > { %v1266_v49 = vsub.f32 %v3247_v43, %v1258_v31 }
 0x50d   : > { %v1271_v52 = vmul.f32 1.442695, %v1266_v49 }
 0x50e   : > { %v1264_v38 = vpop.xlane.xlu0 %1263 }
 0x50f   : > { %v1268_v57 = vsub.f32 %v3254_v29, %v1264_v38 }
 0x511   : > { %v1275_v43 = vmul.f32 1.442695, %v1268_v57 }
 0x513   : > { %v1255_v46 = vpop.xlane.xlu1 %1254 }
 0x514   : > { %v1265_v47 = vsub.f32 %v3261_v36, %v1255_v46 }
 0x516   : > { %v1269_v50 = vmul.f32 1.442695, %v1265_v47 }
 0x517   : > { %v1261_v32 = vpop.xlane.xlu1 %1260 }
 0x518   : > { %v1267_v51 = vsub.f32 %v3268_v40, %v1261_v32 }
 0x51a   : > { %v1273_v60 = vmul.f32 1.442695, %v1267_v51 }
 0x567   : > { %v900_v34 = vpop.xlane.xlu1 %899 }
 0x568   : > { %v897_v44 = vpop.xlane.xlu0 %896  ;;  %2634 = vrcp.f32 %v900_v34 }
 0x569   : > { %2636 = vrcp.f32 %v897_v44 }
 0x56b   : > { %v2592_v37 = vpop.permute.xlu1 %2591 }
 0x56c   : > { %v2594_v39 = vunpack.i.h.bf16 %v2592_v37  ;;  %v2593_v41 = vunpack.i.l.bf16 %v2592_v37  ;;  %v906_v45 = vpop.xlane.xlu0 %905 }
 0x56e   : > { %v2403_v33 = vpack.c.bf16 %v2594_v39, %v2593_v41 }
 0x570   : > { %2404 = vmatprep.subr.bf16.mxu0 %v2403_v33  ;;  %v903_v48 = vpop.xlane.xlu0 %902 }
 0x571   : > { %2638 = vrcp.f32 %v903_v48 }
 0x572   : > { %2640 = vrcp.f32 %v906_v45  ;;  %v2635_v61 = vpop.eup %2634 }
 0x573   : > { %2642 = vpow2.f32 %v1269_v50  ;;  %v2637_v63 = vpop.eup %2636 }
 0x574   : > { %v2597_v59 = vpop.permute.xlu0 %2596  ;;  %2644 = vpow2.f32 %v1271_v52 }
 0x575   : > { %v2599_v0 = vunpack.i.h.bf16 %v2597_v59  ;;  %v2598_v36 = vunpack.i.l.bf16 %v2597_v59  ;;  %2646 = vpow2.f32 %v1273_v60 }
 0x576   : > { %2648 = vpow2.f32 %v1275_v43 }
 0x577   : > { %v2407_v5 = vpack.c.bf16 %v2599_v0, %v2598_v36 }
 0x57b   : > { %v2639_v4 = vpop.eup %2638 }
 0x57c   : > { %v2641_v6 = vpop.eup %2640 }
 0x57d   : > { %v2643_v9 = vpop.eup %2642 }
 0x57e   : > { %v2645_v10 = vpop.eup %2644  ;;  %v1277_v24 = vsel %vm505_vm4, %v2643_v9, 0.0 }
 0x57f   : > { %v2647_v12 = vpop.eup %2646  ;;  %v1280_v23 = vsel %vm505_vm4, %v2645_v10, 0.0 }
 0x580   : > { %v2649_v18 = vpop.eup %2648  ;;  %v1283_v25 = vsel %vm505_vm4, %v2647_v12, 0.0 }
 0x581   : > { %v1286_v58 = vsel %vm505_vm4, %v2649_v18, 0.0 }
 0x5b2   : > { %v2237_v62 = vpop.f32.mrb[12].mxu0 }
 0x5b3   : > { %v1025_v1 = vmul.f32 %v2635_v61, %v2237_v62  ;;  %v1001_v2 = vpop.f32.mrb[13].mxu0 }
 0x5b4   : > { %v1024_v3 = vmul.f32 %v2637_v63, %v1001_v2 }
 0x5b6   : > { %v2240_v40 = vpop.f32.mrb[14].mxu0  ;;  %2245 = vmatprep.mubr.msk.f32.mxu0 %vm399_vm1, %v1024_v3 }
 0x5b7   : > { %v1011_v29 = vpop.f32.mrb[15].mxu0  ;;  %2246 = vmatmul.mubr.msk.f32.vlgmr.msra.gmra.mrb[8].mxu0 %vm399_vm1, %v1025_v1  ;;  %v1027_v8 = vmul.f32 %v2641_v6, %v2240_v40 }
 0x5b8   : > { %v1026_v7 = vmul.f32 %v2639_v4, %v1011_v29  ;;  %2406 = vmatpush3.bf16.msra.mxu0 %v2403_v33 }
 0x5b9   : > { %2408 = vmatprep.subr.bf16.mxu0 %v2407_v5 }
 0x5ba   : > { %2248 = vmatprep.mubr.msk.f32.mxu0 %vm399_vm1, %v1026_v7 }
 0x5bb   : > { %2249 = vmatmul.mubr.msk.f32.gmra.mrb[10].mxu0 %vm399_vm1, %v1027_v8 }
 0x5bc   : > { %2410 = vmatpush3.bf16.msra.mxu0 %v2407_v5  ;;  %2273 = vmatprep.mubr.msk.f32.mxu0 %vm505_vm4, %v2643_v9 }
 0x5bd   : > { %2412 = vmatprep.subr.bf16.mxu0 %v2411_v26 }
 0x5be   : > { %v2299_v11 = vpop.f32.mrb[16].mxu1 }
 0x5bf   : > { %v1628_v13 = vsel %vm377_vm3, %v2299_v11, -inf  ;;  %2274 = vmatmul.mubr.msk.f32.vlgmr.msra.gmra.mrb[16].mxu0 %vm505_vm4, %v2645_v10  ;;  %v1608_v14 = vpop.f32.mrb[17].mxu1 }
 0x5c0   : > { %v1627_v15 = vsel %vm376_vm5, %v1608_v14, -inf  ;;  %2276 = vmatprep.mubr.msk.f32.mxu0 %vm505_vm4, %v2647_v12  ;;  %v1634_v16 = vsel %vm505_vm4, %v1628_v13, -inf  ;;  %2414 = vmatpush3.bf16.msra.mxu0 %v2411_v26  ;;  %v1785_v12 = vld [vmem:[#allocation7 + $0x30] sm:$0xff]  ;;  %v2015_v26 = vld [vmem:[%s3410_s3] ss:$0 sm:$0xff] }
 0x5c1   : > { %1635 = vmax.xlane.f32.xlu0 %v1634_v16  ;;  %v1631_v17 = vsel %vm505_vm4, %v1627_v15, -inf }
 0x5c2   : > { %1632 = vmax.xlane.f32.xlu1 %v1631_v17  ;;  %v2302_v19 = vpop.f32.mrb[18].mxu1 }
 0x5c3   : > { %v1630_v54 = vsel %vm379_vm7, %v2302_v19, -inf  ;;  %2277 = vmatmul.mubr.msk.f32.gmra.mrb[18].mxu0 %vm505_vm4, %v2649_v18  ;;  %v1618_v20 = vpop.f32.mrb[19].mxu1 }
 0x5c4   : > { %v1629_v53 = vsel %vm378_vm6, %v1618_v20, -inf  ;;  %v1640_v21 = vsel %vm505_vm4, %v1630_v54, -inf }
 0x5c5   : > { %1641 = vmax.xlane.f32.xlu0 %v1640_v21  ;;  %v1637_v22 = vsel %vm505_vm4, %v1629_v53, -inf }
 0x5c6   : > { %1638 = vmax.xlane.f32.xlu1 %v1637_v22 }
 0x5c9   : > { %1281 = vadd.xlane.f32.xlu0 %v1280_v23 }
 0x5ca   : > { %1278 = vadd.xlane.f32.xlu1 %v1277_v24 }
 0x5cd   : > { %1287 = vadd.xlane.f32.xlu0 %v1286_v58 }
 0x5ce   : > { %1284 = vadd.xlane.f32.xlu1 %v1283_v25 }
 0x5df   : > { %2601 = vrot.lane.b32.xlu1 %v3087_v35, %s2846_s9 }
 0x5e3   : > { %2606 = vrot.lane.b32.xlu0 %v3098_v42, %s2846_s9 }
 0x64e   : > { %v1636_v27 = vpop.xlane.xlu0 %1635 }
 0x64f   : > { %v1644_v28 = vsub.f32 %v1628_v13, %v1636_v27  ;;  %v1633_v30 = vpop.xlane.xlu1 %1632  ;;  %v1786_v13 = vld [vmem:[#allocation7 + $0x38] sm:$0xff] }
 0x650   : > { %v1643_v46 = vsub.f32 %v1627_v15, %v1633_v30  ;;  %v2435_v14 = vpack.c.bf16 %v1786_v13, %v1785_v12 }
 0x651   : > { %v1649_v32 = vmul.f32 1.442695, %v1644_v28 }
 0x652   : > { %v1647_v34 = vmul.f32 1.442695, %v1643_v46  ;;  %v1642_v37 = vpop.xlane.xlu0 %1641 }
 0x653   : > { %2650 = vpow2.f32 %v1649_v32  ;;  %v1646_v39 = vsub.f32 %v1630_v54, %v1642_v37  ;;  %v1639_v41 = vpop.xlane.xlu1 %1638 }
 0x654   : > { %2652 = vpow2.f32 %v1647_v34  ;;  %v1645_v35 = vsub.f32 %v1629_v53, %v1639_v41 }
 0x655   : > { %v1653_v33 = vmul.f32 1.442695, %v1646_v39 }
 0x656   : > { %v1651_v31 = vmul.f32 1.442695, %v1645_v35  ;;  %v1282_v38 = vpop.xlane.xlu0 %1281 }
 0x657   : > { %2654 = vpow2.f32 %v1653_v33  ;;  %v1279_v44 = vpop.xlane.xlu1 %1278 }
 0x658   : > { %2656 = vpow2.f32 %v1651_v31 }
 0x659   : > { %2658 = vrcp.f32 %v1279_v44 }
 0x65a   : > { %v1288_v42 = vpop.xlane.xlu0 %1287  ;;  %2660 = vrcp.f32 %v1282_v38 }
 0x65b   : > { %v1285_v45 = vpop.xlane.xlu1 %1284 }
 0x65c   : > { %2662 = vrcp.f32 %v1285_v45 }
 0x65d   : > { %v2651_v47 = vpop.eup %2650  ;;  %2664 = vrcp.f32 %v1288_v42 }
 0x65e   : > { %v2653_v48 = vpop.eup %2652  ;;  %v2607_v49 = vpop.permute.xlu0 %2606  ;;  %v1658_v50 = vsel %vm505_vm4, %v2651_v47, 0.0 }
 0x65f   : > { %1659 = vadd.xlane.f32.xlu0 %v1658_v50  ;;  %v2602_v51 = vpop.permute.xlu1 %2601  ;;  %v1655_v52 = vsel %vm505_vm4, %v2653_v48, 0.0  ;;  %v2609_v61 = vunpack.i.h.bf16 %v2607_v49  ;;  %v2608_v62 = vunpack.i.l.bf16 %v2607_v49 }
 0x660   : > { %v2604_v57 = vunpack.i.h.bf16 %v2602_v51  ;;  %v2603_v59 = vunpack.i.l.bf16 %v2602_v51  ;;  %1656 = vadd.xlane.f32.xlu1 %v1655_v52 }
 0x661   : > { %v2655_v60 = vpop.eup %2654  ;;  %v2431_v2 = vpack.c.bf16 %v2609_v61, %v2608_v62 }
 0x662   : > { %v2657_v63 = vpop.eup %2656  ;;  %v2427_v0 = vpack.c.bf16 %v2604_v57, %v2603_v59  ;;  %v1664_v36 = vsel %vm505_vm4, %v2655_v60, 0.0 }
 0x663   : > { %1665 = vadd.xlane.f32.xlu0 %v1664_v36  ;;  %2314 = vmatprep.mubr.msk.f32.mxu1 %vm505_vm4, %v2657_v63  ;;  %v1661_v1 = vsel %vm505_vm4, %v2657_v63, 0.0  ;;  %v2659_v3 = vpop.eup %2658 }
 0x664   : > { %1662 = vadd.xlane.f32.xlu1 %v1661_v1  ;;  %2428 = vmatprep.subr.bf16.mxu0 %v2427_v0  ;;  %v2661_v4 = vpop.eup %2660 }
 0x665   : > { %2439 = vmatprep.subr.bf16.mxu1 %v2427_v0 }
 0x666   : > { %2441 = vmatpush3.bf16.msra.mxu1 %v2427_v0  ;;  %v2663_v7 = vpop.eup %2662 }
 0x667   : > { %2440 = vmatprep.subr.bf16.mxu1 %v2431_v2  ;;  %v2665_v9 = vpop.eup %2664 }
 0x66a   : > { %2442 = vmatpush3.bf16.msra.mxu1 %v2431_v2 }
 0x66d   : > { %2315 = vmatmul.mubr.msk.f32.vlgmr.msra.gmra.mrb[20].mxu1 %vm505_vm4, %v2655_v60 }
 0x692   : > { %v2275_v43 = vpop.f32.mrb[16].mxu0 }
 0x693   : > { %v1379_v40 = vpop.f32.mrb[17].mxu0  ;;  %v1403_v29 = vmul.f32 %v2661_v4, %v2275_v43 }
 0x694   : > { %v1402_v5 = vmul.f32 %v2659_v3, %v1379_v40 }
 0x696   : > { %v2278_v6 = vpop.f32.mrb[18].mxu0  ;;  %2283 = vmatprep.mubr.msk.f32.mxu0 %vm399_vm1, %v1402_v5 }
 0x697   : > { %v1389_v8 = vpop.f32.mrb[19].mxu0  ;;  %2284 = vmatmul.mubr.msk.f32.vlgmr.msra.gmra.mrb[8].mxu0 %vm399_vm1, %v1403_v29  ;;  %v1405_v11 = vmul.f32 %v2665_v9, %v2278_v6 }
 0x698   : > { %v1404_v10 = vmul.f32 %v2663_v7, %v1389_v8  ;;  %2430 = vmatpush3.bf16.msra.mxu0 %v2427_v0 }
 0x699   : > { %2432 = vmatprep.subr.bf16.mxu0 %v2431_v2 }
 0x69a   : > { %2286 = vmatprep.mubr.msk.f32.mxu0 %vm399_vm1, %v1404_v10 }
 0x69b   : > { %2287 = vmatmul.mubr.msk.f32.gmra.mrb[10].mxu0 %vm399_vm1, %v1405_v11 }
 0x69c   : > { %2434 = vmatpush3.bf16.msra.mxu0 %v2431_v2  ;;  %2311 = vmatprep.mubr.msk.f32.mxu0 %vm505_vm4, %v2653_v48 }
 0x69d   : > { %2436 = vmatprep.subr.bf16.mxu0 %v2435_v14 }
 0x69f   : > { %2312 = vmatmul.mubr.msk.f32.vlgmr.msra.gmra.mrb[20].mxu0 %vm505_vm4, %v2651_v47 }
 0x6a0   : > { %2438 = vmatpush3.bf16.msra.mxu0 %v2435_v14 }
 0x6ec   : > { %v1660_v18 = vpop.xlane.xlu0 %1659 }
 0x6ed   : > { %v1657_v17 = vpop.xlane.xlu1 %1656 }
 0x6ee   : > { %2666 = vrcp.f32 %v1657_v17 }
 0x6ef   : > { %2668 = vrcp.f32 %v1660_v18 }
 0x6f0   : > { %v1666_v54 = vpop.xlane.xlu0 %1665 }
 0x6f1   : > { %v1663_v19 = vpop.xlane.xlu1 %1662 }
 0x6f2   : > { %2670 = vrcp.f32 %v1663_v19 }
 0x6f3   : > { %2672 = vrcp.f32 %v1666_v54 }
 0x6f8   : > { %v2667_v53 = vpop.eup %2666 }
 0x6f9   : > { %v2669_v22 = vpop.eup %2668 }
 0x6fc   : > { %v2671_v24 = vpop.eup %2670 }
 0x6fd   : > { %v2673_v55 = vpop.eup %2672 }
 0x740   : > { %v2316_v15 = vpop.f32.mrb[20].mxu1 }
 0x741   : > { %v1767_v16 = vpop.f32.mrb[21].mxu1  ;;  %v1783_v56 = vmul.f32 %v2673_v55, %v2316_v15 }
 0x742   : > { %v1782_v25 = vmul.f32 %v2671_v24, %v1767_v16 }
 0x772   : > { %v2313_v20 = vpop.f32.mrb[20].mxu0 }
 0x773   : > { %v1757_v21 = vpop.f32.mrb[21].mxu0  ;;  %v1781_v58 = vmul.f32 %v2669_v22, %v2313_v20 }
 0x774   : > { %v1780_v23 = vmul.f32 %v2667_v53, %v1757_v21 }
 0x776   : > { %2321 = vmatprep.mubr.msk.f32.mxu0 %vm399_vm1, %v1780_v23 }
 0x777   : > { %2322 = vmatmul.mubr.msk.f32.vlgmr.msra.gmra.mrb[8].mxu0 %vm399_vm1, %v1781_v58 }
 0x778   : > { %2324 = vmatprep.mubr.msk.f32.mxu0 %vm399_vm1, %v1782_v25 }
 0x77b   : > { %2325 = vmatmul.mubr.msk.f32.gmra.mrb[10].mxu0 %vm399_vm1, %v1783_v56 }
 0x84a   : > { %v2323_v27 = vpop.f32.mrb[8].mxu0 }
 0x84b   : > { %v2443_v28 = vadd.f32 %v2323_v27, %v2015_v26  ;;  %v1865_v30 = vpop.f32.mrb[9].mxu0 }
 0x84c   : > { %v2444_v46 = vadd.f32 %v2015_v26, %v1865_v30 }
 0x84d   : > { %1889 = vst.msk [vmem:[%s244_s20 + $0x8] sm:$0xff] %vm267_vm0, %v2443_v28 }
 0x84e   : > { %1888 = vst.msk [vmem:[%s244_s20] sm:$0xff] %vm267_vm0, %v2444_v46  ;;  %v2326_v32 = vpop.f32.mrb[10].mxu0 }
 0x84f   : > { %v2445_v34 = vadd.f32 %v2326_v32, %v2015_v26  ;;  %v1875_v37 = vpop.f32.mrb[11].mxu0 }
 0x850   : > { %v2446_v39 = vadd.f32 %v2015_v26, %v1875_v37 }
 0x851   : > { %1891 = vst.msk [vmem:[%s244_s20 + $0x18] sm:$0xff] %vm267_vm0, %v2445_v34 }
 0x852   : > { %1890 = vst.msk [vmem:[%s244_s20 + $0x10] sm:$0xff] %vm267_vm0, %v2446_v39 }
 0x853   : > { %2773 = shalt.err (!%p2770_p2)
}
 0x854   : > { %s2774_s8 = scalar_lea.hbm %s3361_s13, 512  ;;  %s2778_s9 = scalar_lea.hbm %s3411_s4, 1024 }
 0x855   : > { %p2775_p13 = scmp.ne.s32.totalorder %s3361_s13, %s2774_s8  ;;  %p2779_p4 = scmp.lt.u32.totalorder %s3361_s13, %s3411_s4 }
 0x856   : > { %p2780_p7 = scmp.lt.u32.totalorder %s2778_s9, %s2774_s8  ;;  %p2782_p11 = scmp.lt.u32.totalorder %s2774_s8, %s3361_s13 }
 0x857   : > { %p2776_p6 = pnand %p2775_p13, %p3427_p0 }
 0x858   : > { %p2781_p8 = por %p2780_p7, %p2779_p4 }
 0x859   : > { %p2777_p10 = pneg %p2776_p6 }
 0x85a   : > { %p2783_p1 = por %p2782_p11, %p2781_p8 }
 0x85c   : > { %p2784_p3 = pnand %p2783_p1, %p2777_p10 }
 0x85e   : > { %2787 = shalt.err (!%p2784_p3)
}
 0x85f   : > { %s2848_s20 = smov 128   ;;  %s2849_s5 = smov 8  }
 0x860   : > { %2469 = dma.vmem_to_hbm [thread:$0]  (%p3427_p0), %s3355_s29, 512, %s3361_s13, %s1893_s19, %s2848_s20, %s2848_s20, %s2849_s5  }
 0x861 PF: > { %s1921_s12 = sand.u32 1, %s2818_s15   ;;  %p3428_p5 = scmp.ne.s32.totalorder %s3416_s22, 0 }
 0x862   : > { %p3429_p9 = scmp.ge.s32.totalorder %s2830_s18, 2  ;;  %s1922_s24 = scalar_lea.sflag [#allocation4], %s1921_s12 }
 0x864   : > { %p2483_p12 = pnand %p3429_p9, %p3428_p5 }
 0x866   : > { %2813 = dma.done.wait (!%p2483_p12), %s1922_s24, 512  }
 0x867   : > { %2815 = vsyncadd (!%p2483_p12), %s1922_s24, 4294966784  ;;  %p18_p2 = scmp.ge.s32.totalorder %s2988_s11, 4   ;;  %s3430_s15 = smov %s2822_s16 }
 0x868   : > { %s3431_s16 = smov %s2826_s17  ;;  %s3432_s17 = smov %s2997_s14 }
 0x869   : > { %s3433_s18 = smov %s2988_s11  ;;  %20 = sbr.rel (!%p18_p2) target bundleno = 6 (0x6), region = 92 }
 0x870   :  { %1927 = vsyncpa [#allocation3], 1 }
 0x871   :  { %1929 = vsyncpa [#allocation3 + $0x1], 1 }
 0x872   :  { %1930 = vsyncpa [#allocation6], 1 }
 0x873   :  { %1931 = vsyncpa [#allocation4], 1 }
 0x874   :  { %1933 = vsyncpa [#allocation4 + $0x1], 1 }

</bundles_post_ra>
